<compile_context>
chip_gen: v5e
topology: v5e:2x2
jax: 0.10.0
libtpu: 0.0.40
codegen_flags: <defaults>
</compile_context>

<pallas_src>
import functools

import jax
import jax.numpy as jnp
from jax.experimental import pallas as pl
from jax.experimental.pallas import tpu as pltpu


# ---------------------------------------------------------------------------
# Kernels
# ---------------------------------------------------------------------------

def _se_fused_kernel(x_ref, w1t_ref, b1_ref, w2_ref, b2_ref, o_ref, *, inv_hw):
    """Single-pass SE for a block of bn batch elements.

    x_ref   : (bn, C, HW)  input tile (native dtype)
    w1t_ref : (C, S) f32   (= fc1 weight transposed)
    b1_ref  : (1, S) f32
    w2_ref  : (C, S) f32   (= fc2 weight)
    b2_ref  : (C, 1) f32
    o_ref   : (bn, C, HW)  output tile (native dtype)
    """
    x = x_ref[...]                                                      # (bn, C, HW)

    # Squeeze: per-channel spatial mean in f32 (tiny).
    pooled = jnp.sum(x, axis=-1, keepdims=True, dtype=jnp.float32) * inv_hw  # (bn,C,1)

    # fc1 + SiLU (VPU: broadcast-mul + sublane reduce).
    s = jnp.sum(pooled * w1t_ref[...][None, :, :], axis=1, keepdims=True)     # (bn,1,S)
    s = s + b1_ref[...][None, :, :]
    s = s * jax.nn.sigmoid(s)

    # fc2 + sigmoid (VPU: broadcast-mul + lane reduce).
    e = jnp.sum(s * w2_ref[...][None, :, :], axis=-1, keepdims=True)          # (bn,C,1)
    e = e + b2_ref[...][None, :, :]
    g = jax.nn.sigmoid(e).astype(o_ref.dtype)                                  # (bn,C,1)

    # Excite: gate multiply in the input's native dtype (no full-tile f32 copy).
    o_ref[...] = x * g


def _pool_kernel(x_ref, sums_ref):
    """Fallback pass 1: accumulate per-channel spatial sums in f32.

    x_ref   : (1, C, THW) tile of the input (native dtype).
    sums_ref: (1, C, 1) f32 accumulator, resident across the HW ("arbitrary") axis.
    """
    @pl.when(pl.program_id(1) == 0)
    def _():
        sums_ref[...] = jnp.zeros_like(sums_ref)

    partial = jnp.sum(x_ref[0], axis=-1, keepdims=True, dtype=jnp.float32)   # (C, 1)
    sums_ref[0] = sums_ref[0] + partial


def _apply_kernel(x_ref, g_ref, o_ref):
    """Fallback pass 2: pure resident-gate multiply (excitation already hoisted)."""
    o_ref[0] = x_ref[0] * g_ref[0]


# ---------------------------------------------------------------------------
# Wrapper
# ---------------------------------------------------------------------------

_VMEM_LIMIT_BYTES = 48 * 1024 * 1024     # safe on v7x (64 MiB phys) and v5e/v6e (128 MiB)
_FUSED_BLOCK_BUDGET = 32 * 1024 * 1024   # working-set budget for one fused grid step
_TWO_PASS_TILE_BUDGET = 32 * 1024 * 1024


def _choose_fused_bn(N, C, HW, S, itemsize, budget=_FUSED_BLOCK_BUDGET):
    """Batch elements per fused block; 0 if even a single element does not fit."""
    def block_bytes(bn):
        io = 2 * 2 * bn * C * HW * itemsize      # double-buffered input + output tiles
        f32_tmp = bn * C * HW * 4                # possible f32 staging in the pooled reduce
        exc = 2 * bn * C * S * 4                 # broadcast intermediates in the excitation
        wts = 2 * (2 * C * S + C + S) * 4        # resident weights/biases (double-buffered)
        return io + f32_tmp + exc + wts

    if block_bytes(1) > budget:
        return 0
    for bn in range(min(N, 256), 0, -1):
        if N % bn == 0 and block_bytes(bn) <= budget:
            return bn
    return 1


def _choose_hw_tile(HW, C, itemsize, budget=_TWO_PASS_TILE_BUDGET):
    """Largest legal HW tile: either full HW, or a multiple of 128 dividing HW.

    Returns None if no such tile fits the budget (caller pads HW to a 128 multiple).
    """
    max_t = budget // (4 * C * itemsize)         # 2 buffers x (in tile + out tile)
    if HW <= max_t:
        return HW                                # full extent is always a legal block dim
    t = (max_t // 128) * 128
    while t >= 128:
        if HW % t == 0:
            return t
        t -= 128
    return None


def se_block(x_nchw, w1, b1, w2, b2, *, hw_tile=None, force_two_pass=False):
    """x_nchw: (N, C, H, W); w1: (S, C); b1: (S,); w2: (C, S); b2: (C,)."""
    N, C, H, W = x_nchw.shape
    HW = H * W
    S = w1.shape[0]
    dtype = x_nchw.dtype
    itemsize = dtype.itemsize

    x = x_nchw.reshape(N, C, HW)      # C on sublanes, flattened spatial on lanes
    inv_hw = 1.0 / float(HW)

    use_two_pass = force_two_pass or (hw_tile is not None)
    bn = 0 if use_two_pass else _choose_fused_bn(N, C, HW, S, itemsize)

    # ---- Primary path: single-pass fused kernel (x read once, written once) ----
    if bn > 0:
        # Excitation params in f32, pre-laid-out so the kernel needs no transposes.
        w1t = jnp.asarray(w1, jnp.float32).T.reshape(C, S)    # (C, S)
        b1r = jnp.asarray(b1, jnp.float32).reshape(1, S)      # (1, S)
        w2r = jnp.asarray(w2, jnp.float32).reshape(C, S)      # (C, S)
        b2r = jnp.asarray(b2, jnp.float32).reshape(C, 1)      # (C, 1)

        out = pl.pallas_call(
            functools.partial(_se_fused_kernel, inv_hw=inv_hw),
            out_shape=jax.ShapeDtypeStruct((N, C, HW), dtype),
            grid_spec=pltpu.PrefetchScalarGridSpec(
                num_scalar_prefetch=0,
                grid=(N // bn,),
                in_specs=[
                    pl.BlockSpec((bn, C, HW), lambda i: (i, 0, 0)),
                    pl.BlockSpec((C, S), lambda i: (0, 0)),   # weights stay resident
                    pl.BlockSpec((1, S), lambda i: (0, 0)),
                    pl.BlockSpec((C, S), lambda i: (0, 0)),
                    pl.BlockSpec((C, 1), lambda i: (0, 0)),
                ],
                out_specs=pl.BlockSpec((bn, C, HW), lambda i: (i, 0, 0)),
            ),
            compiler_params=pltpu.CompilerParams(
                dimension_semantics=("parallel",),
                vmem_limit_bytes=_VMEM_LIMIT_BYTES,
            ),
        )(x, w1t, b1r, w2r, b2r)
        return out.reshape(N, C, H, W)

    # ---- Fallback: two-pass path (only for elements too large for VMEM, or forced) ----
    if hw_tile is not None:
        if hw_tile != HW and (hw_tile % 128 != 0 or HW % hw_tile != 0):
            raise ValueError(
                f"hw_tile={hw_tile} must equal HW={HW} or be a multiple of 128 dividing it")
        hw_pad = HW
        x_p = x
    else:
        hw_tile = _choose_hw_tile(HW, C, itemsize)
        if hw_tile is None:
            # No legal 128-multiple tile divides HW: pad the spatial axis (zeros do
            # not perturb the sum; the mean divides by the true HW).
            hw_pad = -(-HW // 128) * 128
            x_p = jnp.pad(x, ((0, 0), (0, 0), (0, hw_pad - HW)))
            hw_tile = _choose_hw_tile(hw_pad, C, itemsize) or 128
        else:
            hw_pad = HW
            x_p = x
    n_hw = hw_pad // hw_tile

    # Pass 1: per-(n, c) spatial sums (f32); HW is the reduction ("arbitrary") axis.
    sums = pl.pallas_call(
        _pool_kernel,
        out_shape=jax.ShapeDtypeStruct((N, C, 1), jnp.float32),
        grid_spec=pltpu.PrefetchScalarGridSpec(
            num_scalar_prefetch=0,
            grid=(N, n_hw),
            in_specs=[pl.BlockSpec((1, C, hw_tile), lambda n, h: (n, 0, h))],
            out_specs=pl.BlockSpec((1, C, 1), lambda n, h: (n, 0, 0)),
        ),
        compiler_params=pltpu.CompilerParams(
            dimension_semantics=("parallel", "arbitrary"),
            vmem_limit_bytes=_VMEM_LIMIT_BYTES,
        ),
    )(x_p)

    # Excitation hoisted out of the kernels: tiny (N, C) plain-JAX math in f32.
    pooled = sums[:, :, 0] * inv_hw                                          # (N, C)
    s = pooled @ jnp.asarray(w1, jnp.float32).T + jnp.asarray(b1, jnp.float32)
    s = s * jax.nn.sigmoid(s)
    e = s @ jnp.asarray(w2, jnp.float32).T + jnp.asarray(b2, jnp.float32)
    gates = jax.nn.sigmoid(e).astype(dtype).reshape(N, C, 1)

    # Pass 2: pure gate multiply; both grid axes independent -> "parallel".
    out_p = pl.pallas_call(
        _apply_kernel,
        out_shape=jax.ShapeDtypeStruct((N, C, hw_pad), dtype),
        grid_spec=pltpu.PrefetchScalarGridSpec(
            num_scalar_prefetch=0,
            grid=(N, n_hw),
            in_specs=[
                pl.BlockSpec((1, C, hw_tile), lambda n, h: (n, 0, h)),
                pl.BlockSpec((1, C, 1), lambda n, h: (n, 0, 0)),
            ],
            out_specs=pl.BlockSpec((1, C, hw_tile), lambda n, h: (n, 0, h)),
        ),
        compiler_params=pltpu.CompilerParams(
            dimension_semantics=("parallel", "parallel"),
            vmem_limit_bytes=_VMEM_LIMIT_BYTES,
        ),
    )(x_p, gates)

    out = out_p[:, :, :HW] if hw_pad != HW else out_p
    return out.reshape(N, C, H, W)


# ---------------------------------------------------------------------------
# Pure-JAX reference mirroring the PyTorch module
# ---------------------------------------------------------------------------

def se_block_ref(x, w1, b1, w2, b2):
    pooled = jnp.mean(x, axis=(2, 3), keepdims=True)                       # (N,C,1,1)
    s = jnp.einsum('nchw,sc->nshw', pooled, w1) + b1[None, :, None, None]  # fc1 (1x1 conv)
    s = s * jax.nn.sigmoid(s)                                              # SiLU
    e = jnp.einsum('nshw,cs->nchw', s, w2) + b2[None, :, None, None]       # fc2 (1x1 conv)
    e = jax.nn.sigmoid(e)
    return e * x


if __name__ == "__main__":
    # Module config: SEBlock(in_channels=4, mbconv_in_channels=4, reduction_ratio=4)
    in_channels = 4
    reduction_ratio = 4
    squeeze_c = max(1, in_channels // reduction_ratio)   # = 1

    N, C, H, W = 2, in_channels, 16, 16

    key = jax.random.PRNGKey(0)
    kx, kw1, kb1, kw2, kb2 = jax.random.split(key, 5)

    x = jax.random.normal(kx, (N, C, H, W), dtype=jnp.float32)
    # Shapes match nn.Conv2d(kernel_size=1) weights with the trailing 1x1 squeezed.
    w1 = jax.random.normal(kw1, (squeeze_c, in_channels), dtype=jnp.float32) * 0.5
    b1 = jax.random.normal(kb1, (squeeze_c,), dtype=jnp.float32) * 0.1
    w2 = jax.random.normal(kw2, (in_channels, squeeze_c), dtype=jnp.float32) * 0.5
    b2 = jax.random.normal(kb2, (in_channels,), dtype=jnp.float32) * 0.1

    ref = se_block_ref(x, w1, b1, w2, b2)

    # 1) Default dispatch: single-pass fused kernel (primary production path).
    out_fused = jax.block_until_ready(se_block(x, w1, b1, w2, b2))
    assert out_fused.shape == (N, C, H, W)
    assert jnp.allclose(out_fused, ref, atol=1e-5, rtol=1e-5), "fused path mismatch"

    # 2) Force the two-pass fallback with a 128-lane HW tile so the multi-tile
    #    accumulation + hoisted-excitation + gate-apply path is exercised too.
    out_tiled = jax.block_until_ready(
        se_block(x, w1, b1, w2, b2, hw_tile=128, force_two_pass=True))
    assert out_tiled.shape == (N, C, H, W)
    assert jnp.allclose(out_tiled, ref, atol=1e-5, rtol=1e-5), "two-pass path mismatch"

    print("KERNEL_OK")
</pallas_src>

<mosaic_0001>
module attributes {stable_mosaic.version = 11 : i64} {
  func.func @_se_fused_kernel(%arg0: i32, %arg1: memref<2x4x256xf32, #tpu.memory_space<vmem>>, %arg2: memref<4x1xf32, #tpu.memory_space<vmem>>, %arg3: memref<1x1xf32, #tpu.memory_space<vmem>>, %arg4: memref<4x1xf32, #tpu.memory_space<vmem>>, %arg5: memref<4x1xf32, #tpu.memory_space<vmem>>, %arg6: memref<2x4x256xf32, #tpu.memory_space<vmem>>) attributes {dimension_semantics = [#tpu.dimension_semantics<parallel>], iteration_bounds = array<i64: 1>, scalar_prefetch = 0 : i64, scratch_operands = 0 : i64, tpu.core_type = #tpu.core_type<tc>, window_params = [{transform_indices = @transform_0, window_bounds = array<i64: 2, 4, 256>}, {pipeline_mode = #tpu.pipeline_mode<synchronous>, transform_indices = @transform_1, window_bounds = array<i64: 4, 1>}, {pipeline_mode = #tpu.pipeline_mode<synchronous>, transform_indices = @transform_2, window_bounds = array<i64: 1, 1>}, {pipeline_mode = #tpu.pipeline_mode<synchronous>, transform_indices = @transform_3, window_bounds = array<i64: 4, 1>}, {pipeline_mode = #tpu.pipeline_mode<synchronous>, transform_indices = @transform_4, window_bounds = array<i64: 4, 1>}, {transform_indices = @transform_5, window_bounds = array<i64: 2, 4, 256>}]} {
    %c0 = arith.constant 0 : index
    %c0_0 = arith.constant 0 : index
    %c0_1 = arith.constant 0 : index
    %0 = vector.load %arg1[%c0, %c0_0, %c0_1] : memref<2x4x256xf32, #tpu.memory_space<vmem>>, vector<2x4x256xf32>
    %cst = arith.constant dense<0.000000e+00> : vector<2x4xf32>
    %1 = vector.multi_reduction <add>, %0, %cst [2] : vector<2x4x256xf32> to vector<2x4xf32>
    %2 = vector.shape_cast %1 : vector<2x4xf32> to vector<2x4x1xf32>
    %cst_2 = arith.constant 3.906250e-03 : f32
    %3 = vector.broadcast %cst_2 : f32 to vector<2x4x1xf32>
    %4 = arith.mulf %2, %3 : vector<2x4x1xf32>
    %c0_3 = arith.constant 0 : index
    %c0_4 = arith.constant 0 : index
    %5 = vector.load %arg2[%c0_3, %c0_4] : memref<4x1xf32, #tpu.memory_space<vmem>>, vector<4x1xf32>
    %6 = vector.shape_cast %5 : vector<4x1xf32> to vector<1x4x1xf32>
    %7 = vector.broadcast %6 : vector<1x4x1xf32> to vector<2x4x1xf32>
    %8 = arith.mulf %4, %7 : vector<2x4x1xf32>
    %cst_5 = arith.constant dense<0.000000e+00> : vector<2x1xf32>
    %9 = vector.multi_reduction <add>, %8, %cst_5 [1] : vector<2x4x1xf32> to vector<2x1xf32>
    %10 = vector.shape_cast %9 : vector<2x1xf32> to vector<2x1x1xf32>
    %c0_6 = arith.constant 0 : index
    %c0_7 = arith.constant 0 : index
    %11 = vector.load %arg3[%c0_6, %c0_7] : memref<1x1xf32, #tpu.memory_space<vmem>>, vector<1x1xf32>
    %12 = vector.shape_cast %11 : vector<1x1xf32> to vector<1x1x1xf32>
    %13 = vector.broadcast %12 : vector<1x1x1xf32> to vector<2x1x1xf32>
    %14 = arith.addf %10, %13 : vector<2x1x1xf32>
    %15 = arith.negf %14 : vector<2x1x1xf32>
    %16 = math.exp %15 : vector<2x1x1xf32>
    %cst_8 = arith.constant 1.000000e+00 : f32
    %17 = vector.broadcast %cst_8 : f32 to vector<2x1x1xf32>
    %18 = arith.addf %17, %16 : vector<2x1x1xf32>
    %19 = arith.divf %17, %18 : vector<2x1x1xf32>
    %20 = arith.mulf %14, %19 : vector<2x1x1xf32>
    %c0_9 = arith.constant 0 : index
    %c0_10 = arith.constant 0 : index
    %21 = vector.load %arg4[%c0_9, %c0_10] : memref<4x1xf32, #tpu.memory_space<vmem>>, vector<4x1xf32>
    %22 = vector.shape_cast %21 : vector<4x1xf32> to vector<1x4x1xf32>
    %23 = vector.broadcast %20 : vector<2x1x1xf32> to vector<2x4x1xf32>
    %24 = vector.broadcast %22 : vector<1x4x1xf32> to vector<2x4x1xf32>
    %25 = arith.mulf %23, %24 : vector<2x4x1xf32>
    %cst_11 = arith.constant dense<0.000000e+00> : vector<2x4xf32>
    %26 = vector.multi_reduction <add>, %25, %cst_11 [2] : vector<2x4x1xf32> to vector<2x4xf32>
    %27 = vector.shape_cast %26 : vector<2x4xf32> to vector<2x4x1xf32>
    %c0_12 = arith.constant 0 : index
    %c0_13 = arith.constant 0 : index
    %28 = vector.load %arg5[%c0_12, %c0_13] : memref<4x1xf32, #tpu.memory_space<vmem>>, vector<4x1xf32>
    %29 = vector.shape_cast %28 : vector<4x1xf32> to vector<1x4x1xf32>
    %30 = vector.broadcast %29 : vector<1x4x1xf32> to vector<2x4x1xf32>
    %31 = arith.addf %27, %30 : vector<2x4x1xf32>
    %32 = arith.negf %31 : vector<2x4x1xf32>
    %33 = math.exp %32 : vector<2x4x1xf32>
    %cst_14 = arith.constant 1.000000e+00 : f32
    %34 = vector.broadcast %cst_14 : f32 to vector<2x4x1xf32>
    %35 = arith.addf %34, %33 : vector<2x4x1xf32>
    %36 = arith.divf %34, %35 : vector<2x4x1xf32>
    %37 = vector.broadcast %36 : vector<2x4x1xf32> to vector<2x4x256xf32>
    %38 = arith.mulf %0, %37 : vector<2x4x256xf32>
    %c0_15 = arith.constant 0 : index
    %c0_16 = arith.constant 0 : index
    %c0_17 = arith.constant 0 : index
    %39 = vector.load %arg6[%c0_15, %c0_16, %c0_17] : memref<2x4x256xf32, #tpu.memory_space<vmem>>, vector<2x4x256xf32>
    tpu.vector_store %arg6[%c0_15, %c0_16, %c0_17], %38 {strides = array<i32>} : memref<2x4x256xf32, #tpu.memory_space<vmem>>, vector<2x4x256xf32>,
    return
  }
  func.func @transform_0(%arg0: i32) -> (i32, i32, i32) {
    %c0_i32 = arith.constant 0 : i32
    %c0_i32_0 = arith.constant 0 : i32
    %c0_i32_1 = arith.constant 0 : i32
    return %arg0, %c0_i32, %c0_i32_0 : i32, i32, i32
  }
  func.func @transform_1(%arg0: i32) -> (i32, i32) {
    %c0_i32 = arith.constant 0 : i32
    %c0_i32_0 = arith.constant 0 : i32
    %c0_i32_1 = arith.constant 0 : i32
    return %c0_i32, %c0_i32_0 : i32, i32
  }
  func.func @transform_2(%arg0: i32) -> (i32, i32) {
    %c0_i32 = arith.constant 0 : i32
    %c0_i32_0 = arith.constant 0 : i32
    %c0_i32_1 = arith.constant 0 : i32
    return %c0_i32, %c0_i32_0 : i32, i32
  }
  func.func @transform_3(%arg0: i32) -> (i32, i32) {
    %c0_i32 = arith.constant 0 : i32
    %c0_i32_0 = arith.constant 0 : i32
    %c0_i32_1 = arith.constant 0 : i32
    return %c0_i32, %c0_i32_0 : i32, i32
  }
  func.func @transform_4(%arg0: i32) -> (i32, i32) {
    %c0_i32 = arith.constant 0 : i32
    %c0_i32_0 = arith.constant 0 : i32
    %c0_i32_1 = arith.constant 0 : i32
    return %c0_i32, %c0_i32_0 : i32, i32
  }
  func.func @transform_5(%arg0: i32) -> (i32, i32, i32) {
    %c0_i32 = arith.constant 0 : i32
    %c0_i32_0 = arith.constant 0 : i32
    %c0_i32_1 = arith.constant 0 : i32
    return %arg0, %c0_i32, %c0_i32_0 : i32, i32, i32
  }
}

</mosaic_0001>

<bundles_post_ra>
// kernel: tpu_custom_call.1
= control target key start
LH: loop header
LB: loop body
LE: loop exit
PB: predicated region body
PF: predicated region fallthrough
CT: control target
= control target key end

     0   :  { %s365_s0 = inlined_call_operand.hbm [shape: f32[2,4,256], index: 0, kind: input, shape index: {}]   ;;  %s366_s1 = inlined_call_operand.vmem [shape: f32[4,1], index: 1, kind: input, shape index: {}]   ;;  %s367_s2 = inlined_call_operand.<no memory space> [shape: f32[1,1], index: 2, kind: input, shape index: {}]   ;;  %s368_s3 = inlined_call_operand.vmem [shape: f32[4,1], index: 3, kind: input, shape index: {}]   ;;  %s369_s4 = inlined_call_operand.vmem [shape: f32[4,1], index: 4, kind: input, shape index: {}]   ;;  %s370_s5 = inlined_call_operand.hbm [shape: f32[2,4,256], index: 5, kind: output, shape index: {}]  }
   0x1   :  { %v10_v0 = vstv %s367_s2 }
   0x2   :  { %11 = vst [vmem:[#allocation2] sm:$0x1] %v10_v0 }
   0x3   :  { %12 = vsyncpa [#allocation4], 0 }
   0x4   :  { %13 = vsyncpa [#allocation5], 0  ;;  %s18_s22 = sshll.u32 %s365_s0, 4  ;;  %s297_s23 = smov [#allocation3]   ;;  %s19_s22 = int_to_ptr.hbm [resolvable:$true] %s18_s22 }
   0x5   :  { %s20_s24 = sshll.u32 %s297_s23, 4  ;;  %s298_s25 = smov 128   ;;  %s21_s24 = int_to_ptr.vmem [resolvable:$true] %s20_s24 }
   0x6   :  { %s299_s26 = smov 8  }
   0x7   :  { %26 = dma.hbm_to_vmem [thread:$0]  %s19_s22, 256, %s21_s24, [#allocation4], %s298_s25, %s298_s25, %s299_s26  }
   0x8   :  { %293 = dma.done.wait [#allocation4], 256  }
   0x9   :  { %294 = vsyncadd [#allocation4], 4294967040  ;;  %v342_v1 = vld [vmem:[#allocation3] sm:$0xff]  ;;  %v344_v2 = vld [vmem:[#allocation3 + $0x8] sm:$0xff]  ;;  %vm54_vm0 = vcmask 1043456   ;;  %vm70_vm1 = vcmask 3072  }
   0xa   :  { %43 = vst [vmem:[#allocation1] ss:$2 sm:$0xff] %v342_v1  ;;  %v67_v13 = vld [vmem:[%s366_s1] sm:$0xf]  ;;  %v85_v28 = vld [vmem:[#allocation2] sm:$0x1] }
   0xb   :  { %47 = vst [vmem:[#allocation1 + $0x10] ss:$2 sm:$0xff] %v344_v2  ;;  %v300_v41 = vmov 0   ;;  %v128_v58 = vld [vmem:[%s368_s3] sm:$0xf]  ;;  %s302_s3 = smov [#allocation6]  }
   0xc   :  { %227 = vset.pattern.permute.xlu1 %v300_v41  ;;  %228 = vset.pattern.permute.xlu0 %v300_v41  ;;  %v135_v63 = vld [vmem:[%s369_s4] sm:$0xf]  ;;  %s202_s4 = sshll.u32 %s302_s3, 4  ;;  %s204_s7 = sshll.u32 %s370_s5, 4  ;;  %s203_s4 = int_to_ptr.vmem [resolvable:$true] %s202_s4  ;;  %s205_s7 = int_to_ptr.hbm [resolvable:$true] %s204_s7 }
  0x11   :  { %v44_v3 = vld.sshfl [vmem:[#allocation1] sm:$0xff pattern:$0x75316420]  ;;  %v45_v4 = vld.sshfl [vmem:[#allocation1 + $0x8] sm:$0xff pattern:$0x75316420] }
  0x12   :  { %v55_v5 = vsel %vm54_vm0, %v44_v3, 0.0  ;;  %v56_v6 = vsel %vm54_vm0, %v45_v4, 0.0  ;;  %v48_v8 = vld.sshfl [vmem:[#allocation1 + $0x10] sm:$0xff pattern:$0x75316420] }
  0x13   :  { %v57_v7 = vadd.f32 %v56_v6, %v55_v5  ;;  %v49_v9 = vld.sshfl [vmem:[#allocation1 + $0x18] sm:$0xff pattern:$0x75316420]  ;;  %v60_v10 = vsel %vm54_vm0, %v48_v8, 0.0 }
  0x14   :  { %v61_v11 = vsel %vm54_vm0, %v49_v9, 0.0 }
  0x15   :  { %58 = vadd.xlane.f32.xlu0 %v57_v7  ;;  %v62_v12 = vadd.f32 %v61_v11, %v60_v10 }
  0x1d   :  { %63 = vadd.xlane.f32.xlu0 %v62_v12 }
  0x88   :  { %v59_v14 = vpop.xlane.xlu0 %58 }
  0x89   :  { %v65_v15 = vmul.f32 0.00390625, %v59_v14 }
  0x8b   :  { %v68_v16 = vmul.f32 %v67_v13, %v65_v15 }
  0x8d   :  { %v71_v17 = vsel %vm70_vm1, %v68_v16, 0.0 }
  0x8e   :  { %v72_v18 = vrot.slane %v71_v17, 4 }
  0x90   :  { %v73_v19 = vadd.f32 %v72_v18, %v71_v17  ;;  %v64_v20 = vpop.xlane.xlu0 %63 }
  0x91   :  { %v66_v21 = vmul.f32 0.00390625, %v64_v20 }
  0x92   :  { %v74_v22 = vrot.slane %v73_v19, 2 }
  0x93   :  { %v69_v23 = vmul.f32 %v67_v13, %v66_v21 }
  0x94   :  { %v75_v24 = vadd.f32 %v74_v22, %v73_v19 }
  0x95   :  { %v78_v25 = vsel %vm70_vm1, %v69_v23, 0.0 }
  0x96   :  { %v76_v26 = vrot.slane %v75_v24, 1  ;;  %v79_v27 = vrot.slane %v78_v25, 4 }
  0x98   :  { %v77_v29 = vadd.f32 %v76_v26, %v75_v24  ;;  %v80_v30 = vadd.f32 %v79_v27, %v78_v25 }
  0x9a   :  { %v86_v31 = vadd.f32 %v85_v28, %v77_v29  ;;  %v81_v32 = vrot.slane %v80_v30, 2 }
  0x9c   :  { %v217_v33 = vmul.f32 -1.442695, %v86_v31  ;;  %v82_v34 = vadd.f32 %v81_v32, %v80_v30 }
  0x9e   :  { %229 = vpow2.f32 %v217_v33  ;;  %v83_v35 = vrot.slane %v82_v34, 1 }
  0xa0   :  { %v84_v36 = vadd.f32 %v83_v35, %v82_v34 }
  0xa2   :  { %v87_v37 = vadd.f32 %v85_v28, %v84_v36 }
  0xa4   :  { %v230_v38 = vpop.eup %229  ;;  %v218_v39 = vmul.f32 -1.442695, %v87_v37 }
  0xa5   :  { %v94_v40 = vadd.f32 1.0, %v230_v38  ;;  %v301_v38 = vmov 839922192  }
  0xa6   :  { %231 = vpow2.f32 %v218_v39  ;;  %v185_v39 = vunpack.c.l.s4 %v301_v38 }
  0xa7   :  { %233 = vrcp.f32 %v94_v40  ;;  %v107_v47 = vand.u32 2147483648, %v94_v40  ;;  %v105_v49 = vand.u32 2147483647, %v94_v40  ;;  %vm101_vm3 = vweird.f32 %v94_v40 }
  0xa9   :  { %v108_v52 = vor.u32 1.1754944e-38, %v107_v47  ;;  %vm106_vm5 = vcmp.eq.f32.partialorder %v105_v49, 8.507059e+37 }
  0xac   :  { %v232_v42 = vpop.eup %231 }
  0xad   :  { %v234_v43 = vpop.eup %233  ;;  %v95_v44 = vadd.f32 1.0, %v232_v42 }
  0xae   :  { %v97_v45 = vmul.f32 %v234_v43, %v94_v40  ;;  %vm102_vm2 = vweird.f32 %v234_v43  ;;  %v186_v40 = vunpack.c.0.s8 %v185_v39 }
  0xaf   :  { %235 = vrcp.f32 %v95_v44  ;;  %vm103_vm4 = vmor %vm101_vm3, %vm102_vm2  ;;  %v122_v59 = vand.u32 2147483648, %v95_v44  ;;  %v120_v62 = vand.u32 2147483647, %v95_v44  ;;  %vm116_vm7 = vweird.f32 %v95_v44 }
  0xb0   :  { %v98_v46 = vsub.f32 1.0, %v97_v45 }
  0xb1   :  { %v123_v4 = vor.u32 1.1754944e-38, %v122_v59  ;;  %vm121_vm9 = vcmp.eq.f32.partialorder %v120_v62, 8.507059e+37 }
  0xb2   :  { %v99_v48 = vmul.f32 %v234_v43, %v98_v46 }
  0xb4   :  { %v100_v50 = vadd.f32 %v234_v43, %v99_v48 }
  0xb5   :  { %v236_v51 = vpop.eup %235 }
  0xb6   :  { %v104_v53 = vsel %vm103_vm4, %v234_v43, %v100_v50  ;;  %v112_v54 = vmul.f32 %v236_v51, %v95_v44  ;;  %vm117_vm6 = vweird.f32 %v236_v51 }
  0xb7   :  { %v109_v55 = vsel %vm106_vm5, %v108_v52, %v104_v53  ;;  %vm118_vm8 = vmor %vm116_vm7, %vm117_vm6 }
  0xb8   :  { %v126_v56 = vmul.f32 %v109_v55, %v86_v31  ;;  %v113_v57 = vsub.f32 1.0, %v112_v54 }
  0xba   :  { %v129_v60 = vperm.slane %v126_v56, 0  ;;  %v114_v61 = vmul.f32 %v236_v51, %v113_v57 }
  0xbc   :  { %v131_v0 = vmul.f32 %v129_v60, %v128_v58  ;;  %v115_v3 = vadd.f32 %v236_v51, %v114_v61 }
  0xbe   :  { %v136_v5 = vadd.f32 %v135_v63, %v131_v0  ;;  %v119_v6 = vsel %vm118_vm8, %v236_v51, %v115_v3 }
  0xbf   :  { %v124_v7 = vsel %vm121_vm9, %v123_v4, %v119_v6 }
  0xc0   :  { %v127_v8 = vmul.f32 %v124_v7, %v87_v37  ;;  %v219_v9 = vmul.f32 -1.442695, %v136_v5 }
  0xc2   :  { %v130_v10 = vperm.slane %v127_v8, 0  ;;  %237 = vpow2.f32 %v219_v9 }
  0xc4   :  { %v132_v11 = vmul.f32 %v130_v10, %v128_v58 }
  0xc6   :  { %v137_v12 = vadd.f32 %v135_v63, %v132_v11 }
  0xc8   :  { %v238_v13 = vpop.eup %237  ;;  %v220_v14 = vmul.f32 -1.442695, %v137_v12 }
  0xc9   :  { %v144_v15 = vadd.f32 1.0, %v238_v13 }
  0xca   :  { %239 = vpow2.f32 %v220_v14 }
  0xcb   :  { %241 = vrcp.f32 %v144_v15  ;;  %v157_v21 = vand.u32 2147483648, %v144_v15  ;;  %v155_v23 = vand.u32 2147483647, %v144_v15  ;;  %vm151_vm11 = vweird.f32 %v144_v15 }
  0xcd   :  { %v158_v26 = vor.u32 1.1754944e-38, %v157_v21  ;;  %vm156_vm13 = vcmp.eq.f32.partialorder %v155_v23, 8.507059e+37 }
  0xd0   :  { %v240_v16 = vpop.eup %239 }
  0xd1   :  { %v242_v17 = vpop.eup %241  ;;  %v145_v18 = vadd.f32 1.0, %v240_v16 }
  0xd2   :  { %v147_v19 = vmul.f32 %v242_v17, %v144_v15  ;;  %vm152_vm10 = vweird.f32 %v242_v17 }
  0xd3   :  { %243 = vrcp.f32 %v145_v18  ;;  %vm153_vm12 = vmor %vm151_vm11, %vm152_vm10  ;;  %v172_v31 = vand.u32 2147483648, %v145_v18  ;;  %v170_v33 = vand.u32 2147483647, %v145_v18  ;;  %vm166_vm15 = vweird.f32 %v145_v18 }
  0xd4   :  { %v148_v20 = vsub.f32 1.0, %v147_v19 }
  0xd5   :  { %v173_v35 = vor.u32 1.1754944e-38, %v172_v31  ;;  %vm171_vm1 = vcmp.eq.f32.partialorder %v170_v33, 8.507059e+37 }
  0xd6   :  { %v149_v22 = vmul.f32 %v242_v17, %v148_v20 }
  0xd8   :  { %v150_v24 = vadd.f32 %v242_v17, %v149_v22 }
  0xd9   :  { %v244_v25 = vpop.eup %243 }
  0xda   :  { %v154_v27 = vsel %vm153_vm12, %v242_v17, %v150_v24  ;;  %v162_v28 = vmul.f32 %v244_v25, %v145_v18  ;;  %vm167_vm14 = vweird.f32 %v244_v25 }
  0xdb   :  { %v159_v29 = vsel %vm156_vm13, %v158_v26, %v154_v27  ;;  %vm168_vm0 = vmor %vm166_vm15, %vm167_vm14 }
  0xdc   :  { %178 = vperm.xlu1 %227, %v159_v29   ;;  %v163_v30 = vsub.f32 1.0, %v162_v28 }
  0xde   :  { %v164_v32 = vmul.f32 %v244_v25, %v163_v30 }
  0xe0   :  { %v165_v34 = vadd.f32 %v244_v25, %v164_v32 }
  0xe2   :  { %v169_v36 = vsel %vm168_vm0, %v244_v25, %v165_v34 }
  0xe3   :  { %v174_v37 = vsel %vm171_vm1, %v173_v35, %v169_v36 }
  0xe4   :  { %182 = vperm.xlu1 %227, %v174_v37  }
 0x14e   :  { %v179_v41 = vpop.permute.xlu1 %178 }
 0x14f   :  { %v187_v42 = vperm.slane %v179_v41, %v186_v40 }
 0x151   :  { %v194_v43 = vmul.f32 %v187_v42, %v342_v1 }
 0x153   :  { %196 = vst [vmem:[#allocation6] sm:$0xff] %v194_v43 }
 0x156   :  { %v183_v44 = vpop.permute.xlu1 %182 }
 0x157   :  { %v191_v45 = vperm.slane %v183_v44, %v186_v40 }
 0x159   :  { %v195_v46 = vmul.f32 %v191_v45, %v344_v2 }
 0x15b   :  { %197 = vst [vmem:[#allocation6 + $0x8] sm:$0xff] %v195_v46 }
 0x15c   :  { %210 = dma.vmem_to_hbm [thread:$0]  %s203_s4, 256, %s205_s7, [#allocation5], %s298_s25, %s298_s25, %s299_s26  }
 0x15d   :  { %295 = dma.done.wait [#allocation5], 256  }
 0x15e   :  { %296 = vsyncadd [#allocation5], 4294967040 }
 0x15f   :  { %215 = vsyncpa [#allocation4], 1 }
 0x160   :  { %216 = vsyncpa [#allocation5], 1 }

</bundles_post_ra>
